<compile_context>
chip_gen: v7x
topology: tpu7x:2x2x1
jax: 0.10.0
libtpu: 0.0.40
codegen_flags: <defaults>
</compile_context>

<pallas_src>
import jax
import jax.numpy as jnp
from jax.experimental import pallas as pl
from jax.experimental.pallas import tpu as pltpu


FEATURES = 10  # Linear(10, 10)


def _b_forward_kernel_t(xt_ref, w3_ref, b_ref, ot_ref):
    """Computes y^T = W3 @ x^T + b  where W3 = 3 * Wc (scale folded into weight).

    xt_ref : (FEATURES, TILE_B)   activations, batch on the lane axis
    w3_ref : (FEATURES, FEATURES) pre-scaled weight (grid-invariant, VMEM-resident)
    b_ref  : (FEATURES, 1)        bias, broadcasts over the batch lanes
    ot_ref : (FEATURES, TILE_B)   lane-dense output block
    """
    ot_ref[...] = (
        jnp.dot(w3_ref[...], xt_ref[...], preferred_element_type=jnp.float32)
        + b_ref[...]
    )


def b_forward(b_inputs, a_inputs, params, *, tile_b=512):
    """JAX/Pallas equivalent of B.forward.

    b_inputs, a_inputs: (batch, 10) float32
    params: dict with 'c_w' (10,10), 'c_b' (10,), 'b_w' (10,10), 'b_b' (10,)
            following PyTorch Linear convention  y = x @ W.T + b.
    Returns the same deeply-nested structure: (((((y,),),),),)
    """
    del a_inputs  # only feeds a dead branch (c_linear(ones + a_inputs))
    batch, feat = b_inputs.shape
    assert feat == FEATURES

    # Fold the x*3 scale into the constant 10x10 weight (free; never pre-scale x).
    w3 = params["c_w"].astype(jnp.float32) * jnp.float32(3.0)  # (10, 10)
    bc = params["c_b"].astype(jnp.float32).reshape(FEATURES, 1)  # (10, 1)

    # Transposed (lane-dense) problem: batch sits on the 128-wide lane axis.
    xt = b_inputs.astype(jnp.float32).T  # (10, batch)

    # Tile the batch (lane) axis.  Full-batch block when small (full-dim
    # exemption from the (8,128) rule); otherwise a multiple-of-128 tile with
    # lane-axis padding so every block is full and stores are unmasked.
    if batch <= tile_b:
        tb = batch
        padded = batch
    else:
        tb = max(128, (tile_b // 128) * 128)
        padded = pl.cdiv(batch, tb) * tb
        if padded != batch:
            xt = jnp.pad(xt, ((0, 0), (0, padded - batch)))

    grid = (padded // tb,)

    yt = pl.pallas_call(
        _b_forward_kernel_t,
        out_shape=jax.ShapeDtypeStruct((FEATURES, padded), jnp.float32),
        grid=grid,
        in_specs=[
            pl.BlockSpec((FEATURES, tb), lambda i: (0, i)),        # x^T, batch-tiled
            pl.BlockSpec((FEATURES, FEATURES), lambda i: (0, 0)),  # weight, invariant
            pl.BlockSpec((FEATURES, 1), lambda i: (0, 0)),         # bias, invariant
        ],
        out_specs=pl.BlockSpec((FEATURES, tb), lambda i: (0, i)),  # lane-dense y^T
        compiler_params=pltpu.CompilerParams(
            dimension_semantics=("parallel",),  # batch tiles independent (2 TCs on v7x)
        ),
    )(xt, w3, bc)

    y = yt[:, :batch].T  # back to (batch, 10)

    # Reproduce the deeply nested output structure of B.forward.
    return (((((y,),),),),)


def init_params(key):
    """Deterministic parameter init matching PyTorch Linear shapes (out, in)."""
    k1, k2, k3, k4 = jax.random.split(key, 4)
    bound = 1.0 / jnp.sqrt(FEATURES)
    return {
        "c_w": jax.random.uniform(k1, (FEATURES, FEATURES), jnp.float32, -bound, bound),
        "c_b": jax.random.uniform(k2, (FEATURES,), jnp.float32, -bound, bound),
        # b_linear params exist in the module but only feed a dead branch.
        "b_w": jax.random.uniform(k3, (FEATURES, FEATURES), jnp.float32, -bound, bound),
        "b_b": jax.random.uniform(k4, (FEATURES,), jnp.float32, -bound, bound),
    }


if __name__ == "__main__":
    key = jax.random.PRNGKey(0)
    kp, kx, ka = jax.random.split(key, 3)

    params = init_params(kp)
    batch = 8
    b_inputs = jax.random.normal(kx, (batch, FEATURES), jnp.float32)
    a_inputs = jax.random.normal(ka, (batch, FEATURES), jnp.float32)

    fwd = jax.jit(b_forward)
    out = fwd(b_inputs, a_inputs, params)
    y = out[0][0][0][0][0]
    jax.block_until_ready(y)

    # Reference check in plain JAX (c_linear(3 * b_inputs)).
    y_ref = (3.0 * b_inputs) @ params["c_w"].T + params["c_b"]
    assert y.shape == (batch, FEATURES)
    assert jnp.allclose(y, y_ref, atol=1e-5, rtol=1e-5), "mismatch vs reference"

    print("KERNEL_OK")
</pallas_src>

<mosaic_0001>
module attributes {stable_mosaic.version = 11 : i64} {
  func.func @_b_forward_kernel_t(%arg0: i32, %arg1: memref<10x8xf32, #tpu.memory_space<vmem>>, %arg2: memref<10x10xf32, #tpu.memory_space<vmem>>, %arg3: memref<10x1xf32, #tpu.memory_space<vmem>>, %arg4: memref<10x8xf32, #tpu.memory_space<vmem>>) attributes {dimension_semantics = [#tpu.dimension_semantics<parallel>], iteration_bounds = array<i64: 1>, scalar_prefetch = 0 : i64, scratch_operands = 0 : i64, tpu.core_type = #tpu.core_type<tc>, window_params = [{transform_indices = @transform_0, window_bounds = array<i64: 10, 8>}, {pipeline_mode = #tpu.pipeline_mode<synchronous>, transform_indices = @transform_1, window_bounds = array<i64: 10, 10>}, {pipeline_mode = #tpu.pipeline_mode<synchronous>, transform_indices = @transform_2, window_bounds = array<i64: 10, 1>}, {transform_indices = @transform_3, window_bounds = array<i64: 10, 8>}]} {
    %c0 = arith.constant 0 : index
    %c0_0 = arith.constant 0 : index
    %0 = vector.load %arg2[%c0, %c0_0] : memref<10x10xf32, #tpu.memory_space<vmem>>, vector<10x10xf32>
    %c0_1 = arith.constant 0 : index
    %c0_2 = arith.constant 0 : index
    %1 = vector.load %arg1[%c0_1, %c0_2] : memref<10x8xf32, #tpu.memory_space<vmem>>, vector<10x8xf32>
    %cst = arith.constant dense<0.000000e+00> : vector<10x8xf32>
    %2 = tpu.matmul %0, %1, %cst {dimension_numbers = #tpu.dot_dimension_numbers<[1], [0], [0], [1], [0, 0, 1, 1], [], []>} : vector<10x10xf32>, vector<10x8xf32>, vector<10x8xf32> -> vector<10x8xf32>
    %c0_3 = arith.constant 0 : index
    %c0_4 = arith.constant 0 : index
    %3 = vector.load %arg3[%c0_3, %c0_4] : memref<10x1xf32, #tpu.memory_space<vmem>>, vector<10x1xf32>
    %4 = vector.broadcast %3 : vector<10x1xf32> to vector<10x8xf32>
    %5 = arith.addf %2, %4 : vector<10x8xf32>
    %c0_5 = arith.constant 0 : index
    %c0_6 = arith.constant 0 : index
    %6 = vector.load %arg4[%c0_5, %c0_6] : memref<10x8xf32, #tpu.memory_space<vmem>>, vector<10x8xf32>
    tpu.vector_store %arg4[%c0_5, %c0_6], %5 {strides = array<i32>} : memref<10x8xf32, #tpu.memory_space<vmem>>, vector<10x8xf32>,
    return
  }
  func.func @transform_0(%arg0: i32) -> (i32, i32) {
    %c0_i32 = arith.constant 0 : i32
    %c0_i32_0 = arith.constant 0 : i32
    return %c0_i32, %arg0 : i32, i32
  }
  func.func @transform_1(%arg0: i32) -> (i32, i32) {
    %c0_i32 = arith.constant 0 : i32
    %c0_i32_0 = arith.constant 0 : i32
    %c0_i32_1 = arith.constant 0 : i32
    return %c0_i32, %c0_i32_0 : i32, i32
  }
  func.func @transform_2(%arg0: i32) -> (i32, i32) {
    %c0_i32 = arith.constant 0 : i32
    %c0_i32_0 = arith.constant 0 : i32
    %c0_i32_1 = arith.constant 0 : i32
    return %c0_i32, %c0_i32_0 : i32, i32
  }
  func.func @transform_3(%arg0: i32) -> (i32, i32) {
    %c0_i32 = arith.constant 0 : i32
    %c0_i32_0 = arith.constant 0 : i32
    return %c0_i32, %arg0 : i32, i32
  }
}

</mosaic_0001>

<bundles_post_ra>
// kernel: b_forward.1
= control target key start
LH: loop header
LB: loop body
LE: loop exit
PB: predicated region body
PF: predicated region fallthrough
CT: control target
= control target key end

     0   :  { %vm37_vm0 = vcmask 1041408   ;;  %vm30_vm1 = vcmask 80896   ;;  %vm147_vm2 = vmmov 1   ;;  %v148_v2 = vmov 0   ;;  %s195_s0 = inlined_call_operand.vmem [shape: f32[10,8], index: 0, kind: input, shape index: {}]   ;;  %s196_s1 = inlined_call_operand.vmem [shape: f32[10,10], index: 1, kind: input, shape index: {}]   ;;  %s197_s2 = inlined_call_operand.vmem [shape: f32[10,1], index: 2, kind: input, shape index: {}]   ;;  %s198_s3 = inlined_call_operand.vmem [shape: f32[10,8], index: 3, kind: output, shape index: {}]  }
   0x1   :  { %v16_v0 = vld [vmem:[%s195_s0] sm:$0xff]  ;;  %v17_v1 = vld [vmem:[%s195_s0 + $0x8] sm:$0x3]  ;;  %vm139_vm3 = vmpackc.low %vm37_vm0, %vm147_vm2  ;;  %146 = vset.pattern.permute.xlu0 %v148_v2  ;;  %vm118_vm4 = vcmask 58368   ;;  %vm116_vm5 = vcmask 64512  }
   0x2   :  { %v138_v3 = vpack.c.bf16 %v17_v1, %v16_v0  ;;  %v14_v4 = vld [vmem:[%s196_s1] sm:$0xff]  ;;  %v19_v6 = vld [vmem:[%s197_s2 + $0x8] sm:$0x3] }
   0x3   :  { %v18_v5 = vld [vmem:[%s197_s2] sm:$0xff]  ;;  %135 = vmatprep.mubr.msk.f32.mxu0 %vm30_vm1, %v14_v4  ;;  %v15_v7 = vld [vmem:[%s196_s1 + $0x8] sm:$0x3] }
   0x4   :  { %22 = vperm.xlu0 %146, %v18_v5   ;;  %140 = vmatprep.subr.msk.bf16.mxu0 %vm139_vm3, %v138_v3 }
   0x5   :  { %143 = vmatpush3.bf16.msk.msra.mxu0 %vm139_vm3, %v138_v3 }
   0x8   :  { %27 = vperm.xlu0 %146, %v19_v6   ;;  %136 = vmatmul.mubr.msk.f32.vlgmr.msra.gmra.mrb[0].mxu0 %vm30_vm1, %v15_v7 }
  0x83   :  { %v23_v8 = vpop.permute.xlu0 %22 }
  0x87   :  { %v28_v9 = vpop.permute.xlu0 %27 }
  0xdb   :  { %v137_v10 = vpop.f32.mrb[0].mxu0 }
  0xdc   :  { %v113_v11 = vadd.f32 %v137_v10, %v28_v9  ;;  %v107_v12 = vpop.f32.mrb[1].mxu0 }
  0xdd   :  { %v108_v13 = vadd.f32 %v107_v12, %v23_v8 }
  0xde   :  { %119 = vst.msk [vmem:[%s198_s3 + $0x8] sm:$0x3] %vm118_vm4, %v113_v11 }
  0xdf   :  { %117 = vst.msk [vmem:[%s198_s3] sm:$0xff] %vm116_vm5, %v108_v13 }

</bundles_post_ra>
